<compile_context>
chip_gen: v5e
topology: v5e:2x2
jax: 0.10.0
libtpu: 0.0.40
codegen_flags: <defaults>
</compile_context>

<pallas_src>
import functools

import jax
import jax.numpy as jnp
from jax.experimental import pallas as pl
from jax.experimental.pallas import tpu as pltpu


def linear_kernel(x_ref, w_ref, b_ref, o_ref):
    # Single-block kernel: all operands resident in VMEM.
    x = x_ref[...]                # (B, IN)
    w = w_ref[...]                # (IN, OUT)  -- pre-transposed weight
    b = b_ref[...]                # (1, OUT)
    acc = jnp.dot(x, w, preferred_element_type=jnp.float32)   # MXU matmul
    o_ref[...] = (acc + b).astype(o_ref.dtype)                 # VPU bias add + store


def prepare_linear_params(weight, bias):
    """One-time parameter prep (done at load time, NOT per call).

    weight: (OUT, IN) f32 (PyTorch nn.Linear layout); bias: (OUT,) f32.
    Returns weight pre-transposed to (IN, OUT) and bias reshaped to (1, OUT).
    No padding: Mosaic handles the sub-tile K/N dims internally.
    """
    return weight.T, bias.reshape(1, -1)


@jax.jit
def linear_pallas(x, w_t, b_row):
    """x: (B, IN) f32; w_t: (IN, OUT); b_row: (1, OUT). Returns (B, OUT)."""
    B, IN = x.shape
    OUT = w_t.shape[1]

    cost = pl.CostEstimate(
        flops=2 * B * IN * OUT,
        transcendentals=0,
        bytes_accessed=4 * (B * IN + IN * OUT + OUT + B * OUT),
    )

    return pl.pallas_call(
        linear_kernel,
        out_shape=jax.ShapeDtypeStruct((B, OUT), x.dtype),
        in_specs=[
            pl.BlockSpec(memory_space=pltpu.MemorySpace.VMEM),
            pl.BlockSpec(memory_space=pltpu.MemorySpace.VMEM),
            pl.BlockSpec(memory_space=pltpu.MemorySpace.VMEM),
        ],
        out_specs=pl.BlockSpec(memory_space=pltpu.MemorySpace.VMEM),
        cost_estimate=cost,
    )(x, w_t, b_row)


if __name__ == "__main__":
    key = jax.random.PRNGKey(0)
    kx, kw, kb = jax.random.split(key, 3)

    B, IN, OUT = 2, 10, 5

    # Deterministic synthetic input & parameters (PyTorch nn.Linear shapes/init).
    x = jax.random.normal(kx, (B, IN), dtype=jnp.float32)
    bound = 1.0 / (IN ** 0.5)
    weight = jax.random.uniform(kw, (OUT, IN), dtype=jnp.float32,
                                minval=-bound, maxval=bound)
    bias = jax.random.uniform(kb, (OUT,), dtype=jnp.float32,
                              minval=-bound, maxval=bound)

    # One-time parameter preparation (transpose only), then the single jit'd call.
    w_t, b_row = prepare_linear_params(weight, bias)
    w_t, b_row = jax.block_until_ready((w_t, b_row))

    y = linear_pallas(x, w_t, b_row)
    jax.block_until_ready(y)

    # Correctness check against plain-JAX reference.
    y_ref = x @ weight.T + bias
    assert y.shape == (B, OUT)
    assert jnp.allclose(y, y_ref, atol=1e-5, rtol=1e-5)

    print("KERNEL_OK")
</pallas_src>

<mosaic_0001>
module attributes {stable_mosaic.version = 11 : i64} {
  func.func @linear_kernel(%arg0: memref<2x10xf32, #tpu.memory_space<vmem>>, %arg1: memref<10x5xf32, #tpu.memory_space<vmem>>, %arg2: memref<1x5xf32, #tpu.memory_space<vmem>>, %arg3: memref<2x5xf32, #tpu.memory_space<vmem>>) attributes {dimension_semantics = [], scalar_prefetch = 0 : i64, scratch_operands = 0 : i64, tpu.core_type = #tpu.core_type<tc>} {
    %c0 = arith.constant 0 : index
    %c0_0 = arith.constant 0 : index
    %0 = vector.load %arg0[%c0, %c0_0] : memref<2x10xf32, #tpu.memory_space<vmem>>, vector<2x10xf32>
    %c0_1 = arith.constant 0 : index
    %c0_2 = arith.constant 0 : index
    %1 = vector.load %arg1[%c0_1, %c0_2] : memref<10x5xf32, #tpu.memory_space<vmem>>, vector<10x5xf32>
    %c0_3 = arith.constant 0 : index
    %c0_4 = arith.constant 0 : index
    %2 = vector.load %arg2[%c0_3, %c0_4] : memref<1x5xf32, #tpu.memory_space<vmem>>, vector<1x5xf32>
    %cst = arith.constant dense<0.000000e+00> : vector<2x5xf32>
    %3 = tpu.matmul %0, %1, %cst {dimension_numbers = #tpu.dot_dimension_numbers<[1], [0], [0], [1], [0, 0, 1, 1], [], []>} : vector<2x10xf32>, vector<10x5xf32>, vector<2x5xf32> -> vector<2x5xf32>
    %4 = vector.broadcast %2 : vector<1x5xf32> to vector<2x5xf32>
    %5 = arith.addf %3, %4 : vector<2x5xf32>
    %c0_5 = arith.constant 0 : index
    %c0_6 = arith.constant 0 : index
    %6 = vector.load %arg3[%c0_5, %c0_6] : memref<2x5xf32, #tpu.memory_space<vmem>>, vector<2x5xf32>
    tpu.vector_store %arg3[%c0_5, %c0_6], %5 {strides = array<i32>} : memref<2x5xf32, #tpu.memory_space<vmem>>, vector<2x5xf32>,
    return
  }
}

</mosaic_0001>

<bundles_post_ra>
// kernel: linear_pallas.1
= control target key start
LH: loop header
LB: loop body
LE: loop exit
PB: predicated region body
PF: predicated region fallthrough
CT: control target
= control target key end

     0   :  { %vm26_vm0 = vcmask 1041408   ;;  %vm22_vm1 = vcmask 80896   ;;  %s134_s0 = inlined_call_operand.vmem [shape: f32[2,10], index: 0, kind: input, shape index: {}]   ;;  %s135_s1 = inlined_call_operand.vmem [shape: f32[10,5], index: 1, kind: input, shape index: {}]   ;;  %s136_s2 = inlined_call_operand.vmem [shape: f32[1,5], index: 2, kind: input, shape index: {}]   ;;  %s137_s3 = inlined_call_operand.hbm [shape: f32[2,5], index: 3, kind: output, shape index: {}]  }
   0x1   :  { %v17_v0 = vld [vmem:[%s135_s1 + $0x8] sm:$0x3]  ;;  %v16_v1 = vld [vmem:[%s135_s1] sm:$0xff] }
   0x2   :  { %68 = vmatpush.msk.msra.mxu0 %vm26_vm0, %v17_v0  ;;  %v15_v2 = vld [vmem:[%s134_s0] sm:$0x3] }
   0x3   :  { %8 = vsyncpa [#allocation3], 0  ;;  %v71_v3 = vld [vmem:[%s136_s2] ss:$0 sm:$0xff]  ;;  %s98_s20 = smov [#allocation2]   ;;  %s59_s24 = sshll.u32 %s137_s3, 4  ;;  %s60_s24 = int_to_ptr.hbm [resolvable:$true] %s59_s24 }
   0x4   :  { %45 = vmatpush.msra.mxu0 %v16_v1  ;;  %s57_s21 = sshll.u32 %s98_s20, 4  ;;  %vm50_vm2 = vcmask 33792   ;;  %s58_s21 = int_to_ptr.vmem [resolvable:$true] %s57_s21 }
   0x5   :  { %69 = vmatmul.msk.f32.vlgmr.msra.gmra.mxu0 %vm22_vm1, %v15_v2 }
  0x82   :  { %v47_v4 = vpop.f32.mrf.mxu0 }
  0x83   :  { %v48_v5 = vadd.f32 %v71_v3, %v47_v4 }
  0x85   :  { %51 = vst.msk [vmem:[#allocation2] sm:$0x3] %vm50_vm2, %v48_v5 }
  0x86   :  { %62 = dma.vmem_to_hbm [thread:$0]  %s58_s21, 32, %s60_s24, [#allocation3]  }
  0x87   :  { %96 = dma.done.wait [#allocation3], 32  }
  0x88   :  { %97 = vsyncadd [#allocation3], 4294967264 }
  0x89   :  { %67 = vsyncpa [#allocation3], 1 }

</bundles_post_ra>
